<compile_context>
chip_gen: v7x
topology: tpu7x:2x2x1
jax: 0.10.0
libtpu: 0.0.40
codegen_flags: <defaults>
</compile_context>

<pallas_src>
import math
import functools

import jax
import jax.numpy as jnp
from jax.experimental import pallas as pl
from jax.experimental.pallas import tpu as pltpu


# ------------------------------- helpers ------------------------------------

def _round_up(x, m):
    return ((x + m - 1) // m) * m


def _choose_tile(dim, wanted):
    """Pick (tile, padded_dim): tile is a multiple of 128, padded_dim a
    multiple of tile covering dim.  Minimize grid steps, then padding, then
    prefer the largest tile (avoids degrading to 128 for awkward dims)."""
    dim128 = _round_up(max(dim, 1), 128)
    wanted = max(128, (min(wanted, dim128) // 128) * 128)
    best = None
    for t in range(wanted, 0, -128):
        padded = _round_up(dim128, t)
        key = (padded // t, padded, -t)
        if best is None or key < best[0]:
            best = (key, t, padded)
    return best[1], best[2]


@functools.lru_cache(maxsize=None)
def _vmem_limit_bytes():
    """Generation-aware scoped-VMEM limit (~3/4 of physical)."""
    try:
        cap = getattr(pltpu.get_tpu_info(), "vmem_capacity_bytes", None)
        if cap:
            return int(cap * 3 // 4)      # ~48 MiB on v7x, ~96 MiB on v5e/v6e
    except Exception:
        pass
    return None                            # keep the compiler's default


# ----------------------------- Pallas kernel ---------------------------------

def _noisy_linear_kernel(x_ref, w_ref, b_ref, o_ref, acc_ref):
    # Grid = (m_tiles, n_tiles, k_tiles); k (reduction) is the last axis.
    k = pl.program_id(2)

    # MXU matmul with rhs already in [K, N] layout (no transpose); both inputs
    # in the compute dtype (bf16 by default), f32 accumulation.
    p = jnp.dot(x_ref[...], w_ref[...], preferred_element_type=jnp.float32)

    @pl.when(k == 0)
    def _():
        acc_ref[...] = p                   # direct write: no zero-fill + RMW

    @pl.when(k > 0)
    def _():
        acc_ref[...] += p

    @pl.when(k == pl.num_programs(2) - 1)
    def _():
        o_ref[...] = (acc_ref[...] + b_ref[...].astype(jnp.float32)
                      ).astype(o_ref.dtype)


# --------------------------- cached jitted forward ---------------------------

@functools.lru_cache(maxsize=None)
def _build_forward(B, K, N, Bp, Kp, Np, TM, TK, TN, cdtype_name, odtype_name):
    """Build (once per shape/dtype) the jitted pad -> pallas_call -> slice."""
    cdtype = jnp.dtype(cdtype_name)
    odtype = jnp.dtype(odtype_name)
    grid = (Bp // TM, Np // TN, Kp // TK)  # reduction (K) last

    call = pl.pallas_call(
        _noisy_linear_kernel,
        out_shape=jax.ShapeDtypeStruct((Bp, Np), odtype),
        grid_spec=pltpu.PrefetchScalarGridSpec(
            num_scalar_prefetch=0,
            grid=grid,
            in_specs=[pl.BlockSpec((TM, TK), lambda i, j, k: (i, k)),
                      pl.BlockSpec((TK, TN), lambda i, j, k: (k, j)),
                      pl.BlockSpec((1, TN), lambda i, j, k: (0, j))],
            out_specs=pl.BlockSpec((TM, TN), lambda i, j, k: (i, j)),
            scratch_shapes=[pltpu.VMEM((TM, TN), jnp.float32)]),
        compiler_params=pltpu.CompilerParams(
            dimension_semantics=("parallel", "parallel", "arbitrary"),
            vmem_limit_bytes=_vmem_limit_bytes()),
    )

    @jax.jit
    def fwd(x, w_eff, b_eff):
        x_p = x.astype(cdtype)
        if (Bp, Kp) != (B, K):
            x_p = jnp.pad(x_p, ((0, Bp - B), (0, Kp - K)))
        y = call(x_p, w_eff, b_eff)
        return y[:B, :N]

    return fwd


# ------------------------------ Python module --------------------------------

class NoisyLinear:
    """JAX/Pallas port of the PyTorch NoisyLinear module (forward pass).

    Master parameters are kept in f32 (PyTorch layout); the kernel-layout
    copies are pre-transposed, padded, folded (mu + sigma*eps) and stored in
    `compute_dtype` (bf16 by default).  Output dtype follows the input dtype.
    """
    # TODO(synk): autograd / requires_grad bookkeeping (noiseless freezes the
    # sigma parameters in PyTorch) is not modelled — forward-only port.

    def __init__(self, in_features, out_features, std_init=0.5,
                 noiseless=False, key=None, compute_dtype=jnp.bfloat16,
                 tile_m=256, tile_n=512, tile_k=1024):
        self.in_features = in_features
        self.out_features = out_features
        self.std_init = std_init
        self.noiseless = noiseless
        self.training = True
        self.compute_dtype = jnp.dtype(compute_dtype)
        self.tile_m = tile_m

        # Padded kernel-layout dims and tiles (multiples of 128; padding is a
        # tile multiple so awkward dims don't degrade to 128-wide tiles).
        self.TK, self.Kp = _choose_tile(in_features, tile_k)
        self.TN, self.Np = _choose_tile(out_features, tile_n)

        if key is None:
            key = jax.random.PRNGKey(0)
        k_wmu, k_bmu, k_noise = jax.random.split(key, 3)

        mu_range = 1.0 / math.sqrt(in_features)
        # Canonical (PyTorch-layout) master parameters, f32.
        self.weight_mu = jax.random.uniform(
            k_wmu, (out_features, in_features), jnp.float32,
            minval=-mu_range, maxval=mu_range)
        self.weight_sigma = jnp.full(
            (out_features, in_features),
            std_init / math.sqrt(in_features), jnp.float32)
        self.bias_mu = jax.random.uniform(
            k_bmu, (out_features,), jnp.float32,
            minval=-mu_range, maxval=mu_range)
        self.bias_sigma = jnp.full(
            (out_features,), std_init / math.sqrt(out_features), jnp.float32)

        self.weight_epsilon = jnp.zeros((out_features, in_features), jnp.float32)
        self.bias_epsilon = jnp.zeros((out_features,), jnp.float32)

        self.reset_noise(k_noise)   # also refreshes the kernel-layout copies

    # --------------------------- noise / params -----------------------------

    @staticmethod
    def _scale_noise(key, size):
        x = jax.random.normal(key, (size,), jnp.float32)
        return jnp.sign(x) * jnp.sqrt(jnp.abs(x))

    def reset_noise(self, key):
        k_in, k_out = jax.random.split(key)
        eps_in = self._scale_noise(k_in, self.in_features)
        eps_out = self._scale_noise(k_out, self.out_features)
        self.weight_epsilon = jnp.outer(eps_out, eps_in)
        self.bias_epsilon = eps_out
        self._refresh_kernel_params()

    def reset_sigmas(self):
        self.weight_sigma = jnp.full(
            (self.out_features, self.in_features),
            self.std_init / math.sqrt(self.in_features), jnp.float32)
        self.bias_sigma = jnp.full(
            (self.out_features,),
            self.std_init / math.sqrt(self.out_features), jnp.float32)
        self._refresh_kernel_params()

    def _refresh_kernel_params(self):
        """Fold mu + sigma*eps in f32, pre-transpose [O,I] -> [Kp,Np], pad to
        tile multiples, cast once to compute_dtype.  Call after any mutation
        of parameters or noise."""
        I, O = self.in_features, self.out_features
        Kp, Np = self.Kp, self.Np

        def pack_w(w):   # [O, I] f32 -> [Kp, Np] compute_dtype
            return jnp.pad(w.T, ((0, Kp - I), (0, Np - O))).astype(self.compute_dtype)

        def pack_b(b):   # [O] f32 -> [1, Np] compute_dtype
            return jnp.pad(b, (0, Np - O)).reshape(1, Np).astype(self.compute_dtype)

        self._w_eval = pack_w(self.weight_mu)
        self._b_eval = pack_b(self.bias_mu)
        if self.noiseless:
            self._w_train, self._b_train = self._w_eval, self._b_eval
        else:
            w_eff = self.weight_mu + self.weight_sigma * self.weight_epsilon
            b_eff = self.bias_mu + self.bias_sigma * self.bias_epsilon
            self._w_train = pack_w(w_eff)
            self._b_train = pack_b(b_eff)

    # ------------------------------ forward ---------------------------------

    def __call__(self, x):
        B, I = x.shape
        assert I == self.in_features

        # Sub-32-bit dtypes pack 2 rows/sublane -> round batch to 16 for bf16.
        sub = 16 if self.compute_dtype.itemsize == 2 else 8
        Bp0 = _round_up(max(B, 1), sub)
        TM = max(sub, (min(self.tile_m, Bp0) // sub) * sub)
        Bp = _round_up(Bp0, TM)

        use_noise = self.training and (not self.noiseless)
        w, b = ((self._w_train, self._b_train) if use_noise
                else (self._w_eval, self._b_eval))

        fwd = _build_forward(B, I, self.out_features, Bp, self.Kp, self.Np,
                             TM, self.TK, self.TN,
                             self.compute_dtype.name, jnp.dtype(x.dtype).name)
        return fwd(x, w, b)


# --------------------------------- main --------------------------------------

if __name__ == "__main__":
    key = jax.random.PRNGKey(0)
    k_param, k_x = jax.random.split(key)

    B, IN, OUT = 8, 32, 64
    layer = NoisyLinear(IN, OUT, std_init=0.5, noiseless=False, key=k_param)
    x = jax.random.normal(k_x, (B, IN), jnp.float32)

    # Training-mode (noisy) forward via the tiled Pallas kernel.
    y_train = jax.block_until_ready(layer(x))

    # Eval-mode forward via the same kernel (mu-only weights).
    layer.training = False
    y_eval = jax.block_until_ready(layer(x))

    # --- references ----------------------------------------------------------
    w_eff = layer.weight_mu + layer.weight_sigma * layer.weight_epsilon
    b_eff = layer.bias_mu + layer.bias_sigma * layer.bias_epsilon

    def rt(a):  # round-trip through the kernel's compute dtype (bf16)
        return a.astype(layer.compute_dtype).astype(jnp.float32)

    # Reference matching the kernel's arithmetic (bf16 inputs, f32 accumulate).
    ref_train_m = rt(x) @ rt(w_eff).T + rt(b_eff)
    ref_eval_m = rt(x) @ rt(layer.weight_mu).T + rt(layer.bias_mu)
    # Pure-f32 F.linear semantics (loose tolerance: bf16 weight storage).
    ref_train_f = x @ w_eff.T + b_eff
    ref_eval_f = x @ layer.weight_mu.T + layer.bias_mu

    assert y_train.shape == (B, OUT) and y_eval.shape == (B, OUT)
    assert y_train.dtype == x.dtype and y_eval.dtype == x.dtype
    assert jnp.allclose(y_train, ref_train_m, atol=1e-3, rtol=1e-3)
    assert jnp.allclose(y_eval, ref_eval_m, atol=1e-3, rtol=1e-3)
    assert jnp.allclose(y_train, ref_train_f, atol=5e-2, rtol=5e-2)
    assert jnp.allclose(y_eval, ref_eval_f, atol=5e-2, rtol=5e-2)

    print("KERNEL_OK")
</pallas_src>

<mosaic_0001>
module attributes {stable_mosaic.version = 11 : i64} {
  func.func @_noisy_linear_kernel(%arg0: i32, %arg1: i32, %arg2: i32, %arg3: memref<16x128xbf16, #tpu.memory_space<vmem>>, %arg4: memref<128x128xbf16, #tpu.memory_space<vmem>>, %arg5: memref<1x128xbf16, #tpu.memory_space<vmem>>, %arg6: memref<16x128xf32, #tpu.memory_space<vmem>>, %arg7: memref<16x128xf32, #tpu.memory_space<vmem>>) attributes {dimension_semantics = [#tpu.dimension_semantics<parallel>, #tpu.dimension_semantics<parallel>, #tpu.dimension_semantics<arbitrary>], iteration_bounds = array<i64: 1, 1, 1>, scalar_prefetch = 0 : i64, scratch_operands = 1 : i64, tpu.core_type = #tpu.core_type<tc>, window_params = [{transform_indices = @transform_0, window_bounds = array<i64: 16, 128>}, {transform_indices = @transform_1, window_bounds = array<i64: 128, 128>}, {transform_indices = @transform_2, window_bounds = array<i64: 1, 128>}, {transform_indices = @transform_3, window_bounds = array<i64: 16, 128>}]} {
    %c0 = arith.constant 0 : index
    %c0_0 = arith.constant 0 : index
    %0 = vector.load %arg3[%c0, %c0_0] : memref<16x128xbf16, #tpu.memory_space<vmem>>, vector<16x128xbf16>
    %c0_1 = arith.constant 0 : index
    %c0_2 = arith.constant 0 : index
    %1 = vector.load %arg4[%c0_1, %c0_2] : memref<128x128xbf16, #tpu.memory_space<vmem>>, vector<128x128xbf16>
    %cst = arith.constant dense<0.000000e+00> : vector<16x128xf32>
    %2 = tpu.matmul %0, %1, %cst {dimension_numbers = #tpu.dot_dimension_numbers<[1], [0], [0], [1], [0, 0, 1, 1], [], []>} : vector<16x128xbf16>, vector<128x128xbf16>, vector<16x128xf32> -> vector<16x128xf32>
    %c0_i32 = arith.constant 0 : i32
    %3 = arith.cmpi eq, %arg2, %c0_i32 : i32
    %4 = arith.extui %3 : i1 to i32
    %c0_i32_3 = arith.constant 0 : i32
    %5 = arith.cmpi ne, %4, %c0_i32_3 : i32
    scf.if %5 {
      %c0_8 = arith.constant 0 : index
      %c0_9 = arith.constant 0 : index
      %12 = vector.load %arg7[%c0_8, %c0_9] : memref<16x128xf32, #tpu.memory_space<vmem>>, vector<16x128xf32>
      tpu.vector_store %arg7[%c0_8, %c0_9], %2 {strides = array<i32>} : memref<16x128xf32, #tpu.memory_space<vmem>>, vector<16x128xf32>,
    } else {
    }
    %c0_i32_4 = arith.constant 0 : i32
    %6 = arith.cmpi sgt, %arg2, %c0_i32_4 : i32
    %7 = arith.extui %6 : i1 to i32
    %c0_i32_5 = arith.constant 0 : i32
    %8 = arith.cmpi ne, %7, %c0_i32_5 : i32
    scf.if %8 {
      %c0_8 = arith.constant 0 : index
      %c0_9 = arith.constant 0 : index
      %12 = vector.load %arg7[%c0_8, %c0_9] : memref<16x128xf32, #tpu.memory_space<vmem>>, vector<16x128xf32>
      %13 = arith.addf %12, %2 : vector<16x128xf32>
      %c0_10 = arith.constant 0 : index
      %c0_11 = arith.constant 0 : index
      %14 = vector.load %arg7[%c0_10, %c0_11] : memref<16x128xf32, #tpu.memory_space<vmem>>, vector<16x128xf32>
      tpu.vector_store %arg7[%c0_10, %c0_11], %13 {strides = array<i32>} : memref<16x128xf32, #tpu.memory_space<vmem>>, vector<16x128xf32>,
    } else {
    }
    %c0_i32_6 = arith.constant 0 : i32
    %9 = arith.cmpi eq, %arg2, %c0_i32_6 : i32
    %10 = arith.extui %9 : i1 to i32
    %c0_i32_7 = arith.constant 0 : i32
    %11 = arith.cmpi ne, %10, %c0_i32_7 : i32
    scf.if %11 {
      %c0_8 = arith.constant 0 : index
      %c0_9 = arith.constant 0 : index
      %12 = vector.load %arg7[%c0_8, %c0_9] : memref<16x128xf32, #tpu.memory_space<vmem>>, vector<16x128xf32>
      %c0_10 = arith.constant 0 : index
      %c0_11 = arith.constant 0 : index
      %13 = vector.load %arg5[%c0_10, %c0_11] : memref<1x128xbf16, #tpu.memory_space<vmem>>, vector<1x128xbf16>
      %14 = arith.extf %13 : vector<1x128xbf16> to vector<1x128xf32>
      %15 = vector.broadcast %14 : vector<1x128xf32> to vector<16x128xf32>
      %16 = arith.addf %12, %15 : vector<16x128xf32>
      %c0_12 = arith.constant 0 : index
      %c0_13 = arith.constant 0 : index
      %17 = vector.load %arg6[%c0_12, %c0_13] : memref<16x128xf32, #tpu.memory_space<vmem>>, vector<16x128xf32>
      tpu.vector_store %arg6[%c0_12, %c0_13], %16 {strides = array<i32>} : memref<16x128xf32, #tpu.memory_space<vmem>>, vector<16x128xf32>,
    } else {
    }
    return
  }
  func.func @transform_0(%arg0: i32, %arg1: i32, %arg2: i32) -> (i32, i32) {
    %c0_i32 = arith.constant 0 : i32
    return %arg0, %arg2 : i32, i32
  }
  func.func @transform_1(%arg0: i32, %arg1: i32, %arg2: i32) -> (i32, i32) {
    %c0_i32 = arith.constant 0 : i32
    return %arg2, %arg1 : i32, i32
  }
  func.func @transform_2(%arg0: i32, %arg1: i32, %arg2: i32) -> (i32, i32) {
    %c0_i32 = arith.constant 0 : i32
    %c0_i32_0 = arith.constant 0 : i32
    return %c0_i32, %arg1 : i32, i32
  }
  func.func @transform_3(%arg0: i32, %arg1: i32, %arg2: i32) -> (i32, i32) {
    %c0_i32 = arith.constant 0 : i32
    return %arg0, %arg1 : i32, i32
  }
}

</mosaic_0001>

<bundles_post_ra>
// kernel: fwd.1
= control target key start
LH: loop header
LB: loop body
LE: loop exit
PB: predicated region body
PF: predicated region fallthrough
CT: control target
= control target key end

     0   :  { %8 = vsyncpa [#allocation4], 0  ;;  %s254_s12 = smov [#allocation3]   ;;  %s303_s0 = inlined_call_operand.vmem [shape: bf16[16,128], index: 0, kind: input, shape index: {}]   ;;  %s304_s1 = inlined_call_operand.hbm [shape: bf16[128,128], index: 1, kind: input, shape index: {}]   ;;  %s305_s2 = inlined_call_operand.vmem [shape: bf16[1,128], index: 2, kind: input, shape index: {}]   ;;  %s306_s3 = inlined_call_operand.vmem [shape: f32[16,128], index: 3, kind: output, shape index: {}]  }
   0x1   :  { %s16_s13 = sshll.u32 %s254_s12, 4  ;;  %s230_s16 = scalar_lea.hbm %s304_s1, 1024  ;;  %s17_s13 = int_to_ptr.vmem [resolvable:$true] %s16_s13 }
   0x2   :  { %p231_p0 = scmp.ne.s32.totalorder %s304_s1, %s230_s16  ;;  %p234_p1 = scmp.lt.u32.totalorder %s230_s16, %s304_s1 }
   0x4   :  { %p236_p2 = pnand %p234_p1, %p231_p0 }
   0x6   :  { %239 = shalt.err (!%p236_p2)
}
   0x7   :  { %s240_s21 = scalar_lea.vmem %s17_s13, 1024  ;;  %p245_p4 = scmp.lt.s32.totalorder %s17_s13, %s17_s13 }
   0x8   :  { %p241_p3 = scmp.ne.s32.totalorder %s17_s13, %s240_s21  ;;  %p246_p5 = scmp.lt.s32.totalorder %s240_s21, %s240_s21 }
   0xa   :  { %p247_p6 = por %p246_p5, %p245_p4 }
   0xc   :  { %p248_p7 = pnand %p247_p6, %p241_p3 }
   0xe   :  { %251 = shalt.err (!%p248_p7)
}
   0xf   :  { %s255_s22 = smov 64   ;;  %s256_s23 = smov 4  }
  0x10   :  { %22 = dma.hbm_to_vmem [thread:$0]  %s304_s1, 1024, %s17_s13, [#allocation4], %s255_s22, %s255_s22, %s256_s23  }
  0x11   :  { %252 = dma.done.wait [#allocation4], 1024  }
  0x12   :  { %253 = vsyncadd [#allocation4], 4294966272  ;;  %v257_v0 = vmov 0.0   ;;  %vm258_vm0 = vmmov 0   ;;  %v221_v1 = vld [vmem:[#allocation3] sm:$0xff]   ;;  %v222_v2 = vld [vmem:[#allocation3 + $0x8] sm:$0xff]   ;;  %v165_v10 = vlaneseq }
  0x13   :  { %196 = vmatprep.subr.bf16.mxu0 %v257_v0  ;;  %212 = vmatprep.mubr.msk.bf16.mxu0 %vm258_vm0, %v257_v0  ;;  %v223_v3 = vld [vmem:[#allocation3 + $0x10] sm:$0xff]   ;;  %v224_v4 = vld [vmem:[#allocation3 + $0x18] sm:$0xff]   ;;  %v225_v5 = vld [vmem:[#allocation3 + $0x20] sm:$0xff]  }
  0x14   :  { %197 = vmatpush3.bf16.msra.mxu0 %v221_v1  ;;  %v226_v6 = vld [vmem:[#allocation3 + $0x28] sm:$0xff]   ;;  %v227_v7 = vld [vmem:[#allocation3 + $0x30] sm:$0xff]   ;;  %v228_v8 = vld [vmem:[#allocation3 + $0x38] sm:$0xff]   ;;  %v166_v11 = vshrl.u32 %v165_v10, 7 }
  0x15   :  { %198 = vmatprep.subr.bf16.mxu0 %v257_v0  ;;  %v229_v9 = vld [vmem:[%s303_s0] sm:$0xff]  }
  0x16   :  { %v163_v12 = vld [vmem:[%s305_s2] sm:$0x1]  ;;  %v167_v14 = vsub.s32 0, %v166_v11 }
  0x17   :  { %v164_v13 = vunpack.c.l.bf16 %v163_v12 }
  0x18   :  { %199 = vmatpush3.bf16.msra.mxu0 %v222_v2 }
  0x19   :  { %200 = vmatprep.subr.bf16.mxu0 %v257_v0  ;;  %v168_v15 = vrot.slane %v164_v13, %v167_v14 }
  0x1c   :  { %201 = vmatpush3.bf16.msra.mxu0 %v223_v3 }
  0x1d   :  { %202 = vmatprep.subr.bf16.mxu0 %v257_v0 }
  0x20   :  { %203 = vmatpush3.bf16.msra.mxu0 %v224_v4 }
  0x21   :  { %204 = vmatprep.subr.bf16.mxu0 %v257_v0 }
  0x24   :  { %205 = vmatpush3.bf16.msra.mxu0 %v225_v5 }
  0x25   :  { %206 = vmatprep.subr.bf16.mxu0 %v257_v0 }
  0x28   :  { %207 = vmatpush3.bf16.msra.mxu0 %v226_v6 }
  0x29   :  { %208 = vmatprep.subr.bf16.mxu0 %v257_v0 }
  0x2c   :  { %209 = vmatpush3.bf16.msra.mxu0 %v227_v7 }
  0x2d   :  { %210 = vmatprep.subr.bf16.mxu0 %v257_v0 }
  0x30   :  { %211 = vmatpush3.bf16.msra.mxu0 %v228_v8 }
  0x33   :  { %213 = vmatmul.mubr.bf16.vlgmr.msra.gmra.mrb[0].mxu0 %v229_v9 }
 0x106   :  { %v135_v16 = vpop.f32.mrb[0].mxu0 }
 0x107   :  { %v169_v17 = vadd.f32 %v168_v15, %v135_v16  ;;  %v214_v18 = vpop.f32.mrb[1].mxu0 }
 0x108   :  { %v138_v19 = vpop.f32.mrb[2].mxu0 }
 0x109   :  { %171 = vst [vmem:[%s306_s3] sm:$0xff] %v169_v17  ;;  %v170_v20 = vadd.f32 %v168_v15, %v138_v19  ;;  %v215_v21 = vpop.f32.mrb[3].mxu0 }
 0x10b   :  { %172 = vst [vmem:[%s306_s3 + $0x8] sm:$0xff] %v170_v20 }
 0x10c   :  { %177 = vsyncpa [#allocation4], 1 }

</bundles_post_ra>
